<compile_context>
chip_gen: v5e
topology: v5e:2x2
jax: 0.10.0
libtpu: 0.0.40
codegen_flags: <defaults>
</compile_context>

<pallas_src>
import jax
import jax.numpy as jnp
from jax.experimental import pallas as pl
from jax.experimental.pallas import tpu as pltpu


LANE = 128  # vreg lane width / MXU tile width


def _round_up(x, m):
    return (x + m - 1) // m * m


# ----------------------------- Pallas kernel -------------------------------
def gcn_aggregate_kernel(a_ref, h_ref, dinv_ref, b_ref, o_ref, acc_ref):
    """K-step of: out = relu(dinv_row * ((A+I) @ H) + b) for one row tile."""
    k = pl.program_id(1)

    @pl.when(k == 0)
    def _():
        acc_ref[...] = jnp.zeros_like(acc_ref)

    # Pure aggregation on the MXU: bf16 operands, f32 accumulation.
    acc_ref[...] += jnp.dot(a_ref[...], h_ref[...],
                            preferred_element_type=jnp.float32)

    @pl.when(k == pl.num_programs(1) - 1)
    def _():
        # Row-scale by D^{-1/2}, bias add and ReLU in f32; lane-dense store.
        o_ref[...] = jnp.maximum(
            dinv_ref[...] * acc_ref[...] + b_ref[...], 0.0
        ).astype(o_ref.dtype)


def _vmem_bytes(tm, tk, f_out, out_itemsize):
    """Rough double-buffered working-set estimate for the aggregation kernel."""
    return (2 * tm * tk * 2          # (A+I) tiles, bf16
            + 2 * tk * f_out * 2     # H tiles, bf16
            + 2 * tm * f_out * out_itemsize  # output tiles
            + tm * f_out * 4         # f32 accumulator
            + 2 * (tm + f_out) * 4)  # dinv + bias (resident, tiny)


def _choose_tiles(n_pad, f_out, out_itemsize):
    # Row tile: largest of {512,256,128} dividing n_pad while keeping >=2 row
    # tiles, so dimension_semantics=("parallel", ...) can shard the row axis
    # across v7x's 2 TensorCores even for small graphs.
    tm = n_pad
    for cand in (512, 256, 128):
        if n_pad % cand == 0 and n_pad // cand >= 2:
            tm = cand
            break
    # Contraction tile: as large as divides n_pad (amortizes ~0.35us/grid-step),
    # shrunk until the working set fits a conservative ~40 MiB budget
    # (v7x VMEM is 64 MiB; v5e/v6e have 128 MiB so this is safe everywhere).
    tk = 128
    for cand in (2048, 1024, 512, 256, 128):
        if n_pad % cand == 0:
            tk = cand
            break
    while tk > 128 and _vmem_bytes(tm, tk, f_out, out_itemsize) > (40 << 20):
        tk //= 2
    return tm, tk


def gcn_aggregate(a_pad, h, dinv, bias, *, out_dtype):
    """Tiled relu(dinv * ((A+I) @ H) + b). Inputs pre-padded to lane multiples."""
    n_pad = a_pad.shape[0]
    f_out = h.shape[1]
    out_itemsize = jnp.dtype(out_dtype).itemsize
    tm, tk = _choose_tiles(n_pad, f_out, out_itemsize)
    vmem_limit = int(min(48 << 20,
                         max(32 << 20, 2 * _vmem_bytes(tm, tk, f_out, out_itemsize))))

    return pl.pallas_call(
        gcn_aggregate_kernel,
        out_shape=jax.ShapeDtypeStruct((n_pad, f_out), out_dtype),
        grid_spec=pltpu.PrefetchScalarGridSpec(
            num_scalar_prefetch=0,
            grid=(n_pad // tm, n_pad // tk),       # (row tiles, contraction tiles)
            in_specs=[
                pl.BlockSpec((tm, tk), lambda i, k: (i, k)),      # (A+I) tile
                pl.BlockSpec((tk, f_out), lambda i, k: (k, 0)),   # H row tile
                pl.BlockSpec((tm, 1), lambda i, k: (i, 0)),       # D^{-1/2} rows
                pl.BlockSpec((1, f_out), lambda i, k: (0, 0)),    # bias (resident)
            ],
            out_specs=pl.BlockSpec((tm, f_out), lambda i, k: (i, 0)),
            scratch_shapes=[pltpu.VMEM((tm, f_out), jnp.float32)],
        ),
        compiler_params=pltpu.CompilerParams(
            dimension_semantics=("parallel", "arbitrary"),  # rows shard, K reduces
            vmem_limit_bytes=vmem_limit,
        ),
    )(a_pad, h, dinv, bias)


# ------------------------------- JAX glue -----------------------------------
def prepare_adjacency(edge_index, num_nodes):
    """Static per-graph preprocessing, done ONCE outside the jitted forward.

    Returns exact integer-count (A + I) padded & cast to bf16 (exact: small
    integers), and D^{-1/2} as an (n_pad, 1) f32 column, padded rows = 0.
    """
    n_pad = _round_up(max(num_nodes, 2 * LANE), 2 * LANE)  # >=2 row tiles of 128
    src = edge_index[0]
    dst = edge_index[1]
    loops = jnp.arange(num_nodes, dtype=edge_index.dtype)
    src = jnp.concatenate([src, loops])
    dst = jnp.concatenate([dst, loops])
    # A[i, j] = number of edges j -> i (messages flow src -> dst).
    a = jnp.zeros((num_nodes, num_nodes), jnp.float32).at[dst, src].add(1.0)
    deg = a.sum(axis=1)
    dinv = jnp.where(deg > 0.0, jax.lax.rsqrt(deg), 0.0)
    a_pad = (jnp.zeros((n_pad, n_pad), jnp.bfloat16)
             .at[:num_nodes, :num_nodes].set(a.astype(jnp.bfloat16)))
    dinv_pad = jnp.zeros((n_pad, 1), jnp.float32).at[:num_nodes, 0].set(dinv)
    return a_pad, dinv_pad


@jax.jit
def gnn_feature_extractor(a_pad, dinv_pad, x, w1, b1, w2, b2):
    """relu(GCN2(relu(GCN1(x)))).  a_pad / dinv_pad come pre-padded per graph."""
    n = x.shape[0]
    n_pad = a_pad.shape[0]
    f_in, f_hid, f_out = x.shape[1], w1.shape[1], w2.shape[1]
    fhid_p, fout_p = _round_up(f_hid, LANE), _round_up(f_out, LANE)
    bf16 = jnp.bfloat16

    x_pad = jnp.zeros((n_pad, f_in), jnp.float32).at[:n, :].set(x)

    # ---- Layer 1: feature transform hoisted out of the grid -----------------
    w1_p = jnp.zeros((f_in, fhid_p), jnp.float32).at[:, :f_hid].set(w1)
    # H1 = D^{-1/2} * (X @ W1): f32 accumulate, single bf16 cast.
    h1 = (dinv_pad * jnp.dot(x_pad, w1_p,
                             preferred_element_type=jnp.float32)).astype(bf16)
    b1_p = jnp.zeros((1, fhid_p), jnp.float32).at[:, :f_hid].set(b1)
    # Padded rows of z1 equal relu(b1); they are neutralized by dinv_pad == 0
    # in the layer-2 pre-scale and sliced off at the end.
    z1 = gcn_aggregate(a_pad, h1, dinv_pad, b1_p, out_dtype=bf16)

    # ---- Layer 2 -------------------------------------------------------------
    w2_p = jnp.zeros((fhid_p, fout_p), bf16).at[:f_hid, :f_out].set(w2.astype(bf16))
    h2 = (dinv_pad * jnp.dot(z1, w2_p,
                             preferred_element_type=jnp.float32)).astype(bf16)
    b2_p = jnp.zeros((1, fout_p), jnp.float32).at[:, :f_out].set(b2)
    z2 = gcn_aggregate(a_pad, h2, dinv_pad, b2_p, out_dtype=jnp.float32)

    return z2[:n, :f_out]


def build_normalized_adjacency(edge_index, num_nodes):
    """Dense A_hat = D^{-1/2} (A + I) D^{-1/2} (f32, for the reference check)."""
    src = edge_index[0]
    dst = edge_index[1]
    loops = jnp.arange(num_nodes, dtype=edge_index.dtype)
    src = jnp.concatenate([src, loops])
    dst = jnp.concatenate([dst, loops])
    a = jnp.zeros((num_nodes, num_nodes), jnp.float32).at[dst, src].add(1.0)
    deg = a.sum(axis=1)
    dinv = jnp.where(deg > 0.0, jax.lax.rsqrt(deg), 0.0)
    return dinv[:, None] * a * dinv[None, :]


def init_params(key, input_size, hidden_size, output_size):
    """Deterministic synthetic parameters (glorot-ish weights, zero bias like PyG)."""
    k1, k2 = jax.random.split(key)
    s1 = (6.0 / (input_size + hidden_size)) ** 0.5
    s2 = (6.0 / (hidden_size + output_size)) ** 0.5
    w1 = jax.random.uniform(k1, (input_size, hidden_size), jnp.float32, -s1, s1)
    w2 = jax.random.uniform(k2, (hidden_size, output_size), jnp.float32, -s2, s2)
    b1 = jnp.zeros((1, hidden_size), jnp.float32)
    b2 = jnp.zeros((1, output_size), jnp.float32)
    return w1, b1, w2, b2


def reference_forward(a_hat, x, w1, b1, w2, b2):
    h = jnp.maximum(a_hat @ (x @ w1) + b1, 0.0)
    return jnp.maximum(a_hat @ (h @ w2) + b2, 0.0)


# --------------------------------- main --------------------------------------
if __name__ == "__main__":
    num_nodes = 16
    num_edges = 48
    input_size, hidden_size, output_size = 8, 32, 16

    key = jax.random.PRNGKey(0)
    k_x, k_e, k_p = jax.random.split(key, 3)

    # Node features and a random directed edge list (graph data).
    x = jax.random.normal(k_x, (num_nodes, input_size), jnp.float32)
    edge_index = jax.random.randint(k_e, (2, num_edges), 0, num_nodes, jnp.int32)
    w1, b1, w2, b2 = init_params(k_p, input_size, hidden_size, output_size)

    # Pad + cast the graph operands once, outside the jitted forward.
    a_pad, dinv_pad = prepare_adjacency(edge_index, num_nodes)
    a_pad, dinv_pad = jax.block_until_ready((a_pad, dinv_pad))

    out = gnn_feature_extractor(a_pad, dinv_pad, x, w1, b1, w2, b2)
    out = jax.block_until_ready(out)

    a_hat = build_normalized_adjacency(edge_index, num_nodes)
    ref = reference_forward(a_hat, x, w1, b1, w2, b2)
    assert out.shape == (num_nodes, output_size)
    # Exact (A+I) + single bf16 cast per layer => tighter tolerance than before.
    assert jnp.allclose(out, ref, atol=2e-2, rtol=2e-2), (
        float(jnp.max(jnp.abs(out - ref)))
    )

    print("KERNEL_OK")
</pallas_src>

<mosaic_0001>
module attributes {stable_mosaic.version = 11 : i64} {
  func.func @gcn_aggregate_kernel(%arg0: i32, %arg1: i32, %arg2: memref<128x256xbf16, #tpu.memory_space<vmem>>, %arg3: memref<256x128xbf16, #tpu.memory_space<vmem>>, %arg4: memref<128x1xf32, #tpu.memory_space<vmem>>, %arg5: memref<1x128xf32, #tpu.memory_space<vmem>>, %arg6: memref<128x128xbf16, #tpu.memory_space<vmem>>, %arg7: memref<128x128xf32, #tpu.memory_space<vmem>>) attributes {dimension_semantics = [#tpu.dimension_semantics<parallel>, #tpu.dimension_semantics<arbitrary>], iteration_bounds = array<i64: 2, 1>, scalar_prefetch = 0 : i64, scratch_operands = 1 : i64, tpu.core_type = #tpu.core_type<tc>, window_params = [{transform_indices = @transform_0, window_bounds = array<i64: 128, 256>}, {transform_indices = @transform_1, window_bounds = array<i64: 256, 128>}, {transform_indices = @transform_2, window_bounds = array<i64: 128, 1>}, {pipeline_mode = #tpu.pipeline_mode<synchronous>, transform_indices = @transform_3, window_bounds = array<i64: 1, 128>}, {transform_indices = @transform_4, window_bounds = array<i64: 128, 128>}]} {
    %c0_i32 = arith.constant 0 : i32
    %0 = arith.cmpi eq, %arg1, %c0_i32 : i32
    %1 = arith.extui %0 : i1 to i32
    %c0_i32_0 = arith.constant 0 : i32
    %2 = arith.cmpi ne, %1, %c0_i32_0 : i32
    scf.if %2 {
      %cst_10 = arith.constant 0.000000e+00 : f32
      %12 = vector.broadcast %cst_10 : f32 to vector<128x128xf32>
      %c0_11 = arith.constant 0 : index
      %c0_12 = arith.constant 0 : index
      %13 = vector.load %arg7[%c0_11, %c0_12] : memref<128x128xf32, #tpu.memory_space<vmem>>, vector<128x128xf32>
      tpu.vector_store %arg7[%c0_11, %c0_12], %12 {strides = array<i32>} : memref<128x128xf32, #tpu.memory_space<vmem>>, vector<128x128xf32>,
    } else {
    }
    %c0 = arith.constant 0 : index
    %c0_1 = arith.constant 0 : index
    %3 = vector.load %arg7[%c0, %c0_1] : memref<128x128xf32, #tpu.memory_space<vmem>>, vector<128x128xf32>
    %c0_2 = arith.constant 0 : index
    %c0_3 = arith.constant 0 : index
    %4 = vector.load %arg2[%c0_2, %c0_3] : memref<128x256xbf16, #tpu.memory_space<vmem>>, vector<128x256xbf16>
    %c0_4 = arith.constant 0 : index
    %c0_5 = arith.constant 0 : index
    %5 = vector.load %arg3[%c0_4, %c0_5] : memref<256x128xbf16, #tpu.memory_space<vmem>>, vector<256x128xbf16>
    %cst = arith.constant dense<0.000000e+00> : vector<128x128xf32>
    %6 = tpu.matmul %4, %5, %cst {dimension_numbers = #tpu.dot_dimension_numbers<[1], [0], [0], [1], [0, 0, 1, 1], [], []>} : vector<128x256xbf16>, vector<256x128xbf16>, vector<128x128xf32> -> vector<128x128xf32>
    %7 = arith.addf %3, %6 : vector<128x128xf32>
    %c0_6 = arith.constant 0 : index
    %c0_7 = arith.constant 0 : index
    %8 = vector.load %arg7[%c0_6, %c0_7] : memref<128x128xf32, #tpu.memory_space<vmem>>, vector<128x128xf32>
    tpu.vector_store %arg7[%c0_6, %c0_7], %7 {strides = array<i32>} : memref<128x128xf32, #tpu.memory_space<vmem>>, vector<128x128xf32>,
    %c0_i32_8 = arith.constant 0 : i32
    %9 = arith.cmpi eq, %arg1, %c0_i32_8 : i32
    %10 = arith.extui %9 : i1 to i32
    %c0_i32_9 = arith.constant 0 : i32
    %11 = arith.cmpi ne, %10, %c0_i32_9 : i32
    scf.if %11 {
      %c0_10 = arith.constant 0 : index
      %c0_11 = arith.constant 0 : index
      %12 = vector.load %arg4[%c0_10, %c0_11] : memref<128x1xf32, #tpu.memory_space<vmem>>, vector<128x1xf32>
      %c0_12 = arith.constant 0 : index
      %c0_13 = arith.constant 0 : index
      %13 = vector.load %arg7[%c0_12, %c0_13] : memref<128x128xf32, #tpu.memory_space<vmem>>, vector<128x128xf32>
      %14 = vector.broadcast %12 : vector<128x1xf32> to vector<128x128xf32>
      %15 = arith.mulf %14, %13 : vector<128x128xf32>
      %c0_14 = arith.constant 0 : index
      %c0_15 = arith.constant 0 : index
      %16 = vector.load %arg5[%c0_14, %c0_15] : memref<1x128xf32, #tpu.memory_space<vmem>>, vector<1x128xf32>
      %17 = vector.broadcast %16 : vector<1x128xf32> to vector<128x128xf32>
      %18 = arith.addf %15, %17 : vector<128x128xf32>
      %cst_16 = arith.constant 0.000000e+00 : f32
      %19 = vector.broadcast %cst_16 : f32 to vector<128x128xf32>
      %20 = arith.maximumf %18, %19 : vector<128x128xf32>
      %21 = arith.truncf %20 : vector<128x128xf32> to vector<128x128xbf16>
      %c0_17 = arith.constant 0 : index
      %c0_18 = arith.constant 0 : index
      %22 = vector.load %arg6[%c0_17, %c0_18] : memref<128x128xbf16, #tpu.memory_space<vmem>>, vector<128x128xbf16>
      tpu.vector_store %arg6[%c0_17, %c0_18], %21 {strides = array<i32>} : memref<128x128xbf16, #tpu.memory_space<vmem>>, vector<128x128xbf16>,
    } else {
    }
    return
  }
  func.func @transform_0(%arg0: i32, %arg1: i32) -> (i32, i32) {
    %c0_i32 = arith.constant 0 : i32
    return %arg0, %arg1 : i32, i32
  }
  func.func @transform_1(%arg0: i32, %arg1: i32) -> (i32, i32) {
    %c0_i32 = arith.constant 0 : i32
    %c0_i32_0 = arith.constant 0 : i32
    return %arg1, %c0_i32 : i32, i32
  }
  func.func @transform_2(%arg0: i32, %arg1: i32) -> (i32, i32) {
    %c0_i32 = arith.constant 0 : i32
    %c0_i32_0 = arith.constant 0 : i32
    return %arg0, %c0_i32 : i32, i32
  }
  func.func @transform_3(%arg0: i32, %arg1: i32) -> (i32, i32) {
    %c0_i32 = arith.constant 0 : i32
    %c0_i32_0 = arith.constant 0 : i32
    %c0_i32_1 = arith.constant 0 : i32
    return %c0_i32, %c0_i32_0 : i32, i32
  }
  func.func @transform_4(%arg0: i32, %arg1: i32) -> (i32, i32) {
    %c0_i32 = arith.constant 0 : i32
    %c0_i32_0 = arith.constant 0 : i32
    return %arg0, %c0_i32 : i32, i32
  }
}

module attributes {stable_mosaic.version = 11 : i64} {
  func.func @gcn_aggregate_kernel(%arg0: i32, %arg1: i32, %arg2: memref<128x256xbf16, #tpu.memory_space<vmem>>, %arg3: memref<256x128xbf16, #tpu.memory_space<vmem>>, %arg4: memref<128x1xf32, #tpu.memory_space<vmem>>, %arg5: memref<1x128xf32, #tpu.memory_space<vmem>>, %arg6: memref<128x128xf32, #tpu.memory_space<vmem>>, %arg7: memref<128x128xf32, #tpu.memory_space<vmem>>) attributes {dimension_semantics = [#tpu.dimension_semantics<parallel>, #tpu.dimension_semantics<arbitrary>], iteration_bounds = array<i64: 2, 1>, scalar_prefetch = 0 : i64, scratch_operands = 1 : i64, tpu.core_type = #tpu.core_type<tc>, window_params = [{transform_indices = @transform_0, window_bounds = array<i64: 128, 256>}, {transform_indices = @transform_1, window_bounds = array<i64: 256, 128>}, {transform_indices = @transform_2, window_bounds = array<i64: 128, 1>}, {pipeline_mode = #tpu.pipeline_mode<synchronous>, transform_indices = @transform_3, window_bounds = array<i64: 1, 128>}, {transform_indices = @transform_4, window_bounds = array<i64: 128, 128>}]} {
    %c0_i32 = arith.constant 0 : i32
    %0 = arith.cmpi eq, %arg1, %c0_i32 : i32
    %1 = arith.extui %0 : i1 to i32
    %c0_i32_0 = arith.constant 0 : i32
    %2 = arith.cmpi ne, %1, %c0_i32_0 : i32
    scf.if %2 {
      %cst_10 = arith.constant 0.000000e+00 : f32
      %12 = vector.broadcast %cst_10 : f32 to vector<128x128xf32>
      %c0_11 = arith.constant 0 : index
      %c0_12 = arith.constant 0 : index
      %13 = vector.load %arg7[%c0_11, %c0_12] : memref<128x128xf32, #tpu.memory_space<vmem>>, vector<128x128xf32>
      tpu.vector_store %arg7[%c0_11, %c0_12], %12 {strides = array<i32>} : memref<128x128xf32, #tpu.memory_space<vmem>>, vector<128x128xf32>,
    } else {
    }
    %c0 = arith.constant 0 : index
    %c0_1 = arith.constant 0 : index
    %3 = vector.load %arg7[%c0, %c0_1] : memref<128x128xf32, #tpu.memory_space<vmem>>, vector<128x128xf32>
    %c0_2 = arith.constant 0 : index
    %c0_3 = arith.constant 0 : index
    %4 = vector.load %arg2[%c0_2, %c0_3] : memref<128x256xbf16, #tpu.memory_space<vmem>>, vector<128x256xbf16>
    %c0_4 = arith.constant 0 : index
    %c0_5 = arith.constant 0 : index
    %5 = vector.load %arg3[%c0_4, %c0_5] : memref<256x128xbf16, #tpu.memory_space<vmem>>, vector<256x128xbf16>
    %cst = arith.constant dense<0.000000e+00> : vector<128x128xf32>
    %6 = tpu.matmul %4, %5, %cst {dimension_numbers = #tpu.dot_dimension_numbers<[1], [0], [0], [1], [0, 0, 1, 1], [], []>} : vector<128x256xbf16>, vector<256x128xbf16>, vector<128x128xf32> -> vector<128x128xf32>
    %7 = arith.addf %3, %6 : vector<128x128xf32>
    %c0_6 = arith.constant 0 : index
    %c0_7 = arith.constant 0 : index
    %8 = vector.load %arg7[%c0_6, %c0_7] : memref<128x128xf32, #tpu.memory_space<vmem>>, vector<128x128xf32>
    tpu.vector_store %arg7[%c0_6, %c0_7], %7 {strides = array<i32>} : memref<128x128xf32, #tpu.memory_space<vmem>>, vector<128x128xf32>,
    %c0_i32_8 = arith.constant 0 : i32
    %9 = arith.cmpi eq, %arg1, %c0_i32_8 : i32
    %10 = arith.extui %9 : i1 to i32
    %c0_i32_9 = arith.constant 0 : i32
    %11 = arith.cmpi ne, %10, %c0_i32_9 : i32
    scf.if %11 {
      %c0_10 = arith.constant 0 : index
      %c0_11 = arith.constant 0 : index
      %12 = vector.load %arg4[%c0_10, %c0_11] : memref<128x1xf32, #tpu.memory_space<vmem>>, vector<128x1xf32>
      %c0_12 = arith.constant 0 : index
      %c0_13 = arith.constant 0 : index
      %13 = vector.load %arg7[%c0_12, %c0_13] : memref<128x128xf32, #tpu.memory_space<vmem>>, vector<128x128xf32>
      %14 = vector.broadcast %12 : vector<128x1xf32> to vector<128x128xf32>
      %15 = arith.mulf %14, %13 : vector<128x128xf32>
      %c0_14 = arith.constant 0 : index
      %c0_15 = arith.constant 0 : index
      %16 = vector.load %arg5[%c0_14, %c0_15] : memref<1x128xf32, #tpu.memory_space<vmem>>, vector<1x128xf32>
      %17 = vector.broadcast %16 : vector<1x128xf32> to vector<128x128xf32>
      %18 = arith.addf %15, %17 : vector<128x128xf32>
      %cst_16 = arith.constant 0.000000e+00 : f32
      %19 = vector.broadcast %cst_16 : f32 to vector<128x128xf32>
      %20 = arith.maximumf %18, %19 : vector<128x128xf32>
      %c0_17 = arith.constant 0 : index
      %c0_18 = arith.constant 0 : index
      %21 = vector.load %arg6[%c0_17, %c0_18] : memref<128x128xf32, #tpu.memory_space<vmem>>, vector<128x128xf32>
      tpu.vector_store %arg6[%c0_17, %c0_18], %20 {strides = array<i32>} : memref<128x128xf32, #tpu.memory_space<vmem>>, vector<128x128xf32>,
    } else {
    }
    return
  }
  func.func @transform_0(%arg0: i32, %arg1: i32) -> (i32, i32) {
    %c0_i32 = arith.constant 0 : i32
    return %arg0, %arg1 : i32, i32
  }
  func.func @transform_1(%arg0: i32, %arg1: i32) -> (i32, i32) {
    %c0_i32 = arith.constant 0 : i32
    %c0_i32_0 = arith.constant 0 : i32
    return %arg1, %c0_i32 : i32, i32
  }
  func.func @transform_2(%arg0: i32, %arg1: i32) -> (i32, i32) {
    %c0_i32 = arith.constant 0 : i32
    %c0_i32_0 = arith.constant 0 : i32
    return %arg0, %c0_i32 : i32, i32
  }
  func.func @transform_3(%arg0: i32, %arg1: i32) -> (i32, i32) {
    %c0_i32 = arith.constant 0 : i32
    %c0_i32_0 = arith.constant 0 : i32
    %c0_i32_1 = arith.constant 0 : i32
    return %c0_i32, %c0_i32_0 : i32, i32
  }
  func.func @transform_4(%arg0: i32, %arg1: i32) -> (i32, i32) {
    %c0_i32 = arith.constant 0 : i32
    %c0_i32_0 = arith.constant 0 : i32
    return %arg0, %c0_i32 : i32, i32
  }
}

</mosaic_0001>

<bundles_post_ra>
// kernel: gnn_feature_extractor.3
= control target key start
LH: loop header
LB: loop body
LE: loop exit
PB: predicated region body
PF: predicated region fallthrough
CT: control target
= control target key end

     0   :  { %s1218_s15 = smov 0   ;;  %s1220_s16 = smov 0   ;;  %s1410_s0 = inlined_call_operand.vmem [shape: bf16[256,256], index: 0, kind: input, shape index: {}]   ;;  %s1411_s1 = inlined_call_operand.vmem [shape: bf16[256,128], index: 1, kind: input, shape index: {}]   ;;  %s1412_s2 = inlined_call_operand.vmem [shape: f32[256,1], index: 2, kind: input, shape index: {}]   ;;  %s1413_s3 = inlined_call_operand.vmem [shape: f32[1,128], index: 3, kind: input, shape index: {}]   ;;  %s1414_s4 = inlined_call_operand.vmem [shape: f32[256,128], index: 4, kind: output, shape index: {}]  }
   0x1   :  { %s1222_s17 = smov 0  }
   0x2 LB: > { %s26_s18 = sadd.s32 1, %s1186_s16  ;;  %p952_p0 = scmp.ge.s32.totalorder %s1190_s17, 1  ;;  %s1190_s17 = sphi %s1222_s17, %s14_s17   ;;  %s1186_s16 = sphi %s1220_s16, %s1416_s16   ;;  %s1182_s15 = sphi %s1218_s15, %s1415_s15  }
   0x3   : > { %p28_p1 = scmp.ge.s32.totalorder %s26_s18, 2  ;;  %p205_p2 = scmp.lt.s32.totalorder %s1190_s17, 3 }
   0x5   : > { %s1418_s18 = smov (%p28_p1, %s26_s18), 0  ;;  %p206_p3 = pnand %p952_p0, %p205_p2 }
   0x6   : > { %s953_s23 = sshll.u32 (!%p206_p3), %s1182_s15, 4 }
   0x7   : > { %209 = sbr.rel (%p206_p3) target bundleno = 243 (0xf3), region = 36  ;;  %p248_p4 = scmp.lt.s32.totalorder (!%p206_p3), %s953_s23, 31 }
   0xc   : > { %v1114_v0 = vld [vmem:[%s1411_s1 + $0x38] sm:$0xff]  ;;  %v1192_v2 = vmov 0   ;;  %v1113_v3 = vld [vmem:[%s1411_s1 + $0x30] sm:$0xff]  ;;  %s1420_s23 = smov (!%p248_p4, %s953_s23), 31  ;;  %v1112_v5 = vld [vmem:[%s1411_s1 + $0x28] sm:$0xff] }
   0xd   : > { %v1122_v1 = vld [vmem:[%s1411_s1 + $0x78] sm:$0xff]  ;;  %1164 = vset.pattern.permute.xlu0 %v1192_v2  ;;  %1165 = vset.pattern.permute.xlu1 %v1192_v2  ;;  %v1121_v4 = vld [vmem:[%s1411_s1 + $0x70] sm:$0xff]  ;;  %s1248_s28 = sshll.u32 %s1420_s23, 3  ;;  %v1120_v6 = vld [vmem:[%s1411_s1 + $0x68] sm:$0xff] }
   0xe   : > { %536 = vmatpush.bf16.msra.mxu0 %v1114_v0  ;;  %1123 = vmatpush.bf16.msra.mxu2 %v1114_v0  ;;  %s1257_s7 = scalar_lea.vmem %s1412_s2, %s1248_s28  ;;  %v1111_v9 = vld [vmem:[%s1411_s1 + $0x20] sm:$0xff]  ;;  %v1110_v12 = vld [vmem:[%s1411_s1 + $0x18] sm:$0xff]  ;;  %v1109_v14 = vld [vmem:[%s1411_s1 + $0x10] sm:$0xff]  ;;  %s1293_s30 = scalar_lea.vmem %s1410_s0, %s1248_s28 }
   0xf   : > { %585 = vmatpush.bf16.msra.mxu1 %v1122_v1  ;;  %1131 = vmatpush.bf16.msra.mxu3 %v1122_v1  ;;  %v669_v7 = vld [vmem:[%s1257_s7] sm:$0xff]  ;;  %v671_v8 = vld [vmem:[%s1257_s7 + $0x10] sm:$0xff]  ;;  %v670_v11 = vld [vmem:[%s1257_s7 + $0x8] sm:$0xff]  ;;  %s1360_s15 = scalar_lea.vmem %s1414_s4, %s1248_s28 }
  0x10   : > { %1166 = vset.pattern.permute.xlu2 %v1192_v2  ;;  %703 = vperm.xlu0 %1164, %v669_v7   ;;  %v1119_v10 = vld [vmem:[%s1411_s1 + $0x60] sm:$0xff]  ;;  %v1118_v13 = vld [vmem:[%s1411_s1 + $0x58] sm:$0xff]  ;;  %v1117_v17 = vld [vmem:[%s1411_s1 + $0x50] sm:$0xff] }
  0x11   : > { %713 = vperm.xlu1 %1165, %v671_v8   ;;  %v672_v15 = vld [vmem:[%s1257_s7 + $0x18] sm:$0xff]  ;;  %v673_v16 = vld [vmem:[%s1257_s7 + $0x20] sm:$0xff]  ;;  %v675_v18 = vld [vmem:[%s1257_s7 + $0x30] sm:$0xff] }
  0x12   : > { %537 = vmatpush.bf16.msra.mxu0 %v1113_v3  ;;  %1124 = vmatpush.bf16.msra.mxu2 %v1113_v3  ;;  %v1108_v19 = vld [vmem:[%s1411_s1 + $0x8] sm:$0xff]  ;;  %v1107_v21 = vld [vmem:[%s1411_s1] sm:$0xff]  ;;  %v676_v25 = vld [vmem:[%s1257_s7 + $0x38] sm:$0xff] }
  0x13   : > { %586 = vmatpush.bf16.msra.mxu1 %v1121_v4  ;;  %1132 = vmatpush.bf16.msra.mxu3 %v1121_v4  ;;  %v1116_v20 = vld [vmem:[%s1411_s1 + $0x48] sm:$0xff]  ;;  %v1115_v22 = vld [vmem:[%s1411_s1 + $0x40] sm:$0xff]  ;;  %v679_v38 = vld [vmem:[%s1257_s7 + $0x50] sm:$0xff] }
  0x14   : > { %723 = vperm.xlu2 %1166, %v673_v16   ;;  %v962_v23 = vld [vmem:[%s1293_s30] sm:$0xf]  ;;  %v1092_v24 = vld [vmem:[%s1293_s30 + $0x4] sm:$0xf0]  ;;  %v1091_v28 = vld [vmem:[%s1293_s30 + $0x4] sm:$0xf] }
  0x15   : > { %v994_v26 = vld [vmem:[%s1293_s30 + $0x40] sm:$0xf]  ;;  %v1100_v27 = vld [vmem:[%s1293_s30 + $0x44] sm:$0xf0]  ;;  %v964_v29 = vld [vmem:[%s1293_s30 + $0x8] sm:$0xf0]  ;;  %v963_v32 = vor.u32 %v1092_v24, %v962_v23 }
  0x16   : > { %538 = vmatpush.bf16.msra.mxu0 %v1112_v5  ;;  %1125 = vmatpush.bf16.msra.mxu2 %v1112_v5  ;;  %v1099_v30 = vld [vmem:[%s1293_s30 + $0x44] sm:$0xf]  ;;  %v996_v31 = vld [vmem:[%s1293_s30 + $0x48] sm:$0xf0]  ;;  %v995_v33 = vor.u32 %v1100_v27, %v994_v26  ;;  %v967_v35 = vor.u32 %v1091_v28, %v964_v29  ;;  %v970_v41 = vld [vmem:[%s1293_s30 + $0x10] sm:$0xf] }
  0x17   : > { %587 = vmatpush.bf16.msra.mxu1 %v1120_v6  ;;  %1133 = vmatpush.bf16.msra.mxu3 %v1120_v6  ;;  %v678_v34 = vld [vmem:[%s1257_s7 + $0x48] sm:$0xff]  ;;  %v999_v36 = vor.u32 %v1099_v30, %v996_v31  ;;  %v681_v39 = vld [vmem:[%s1257_s7 + $0x60] sm:$0xff]  ;;  %v1094_v42 = vld [vmem:[%s1293_s30 + $0x14] sm:$0xf0] }
  0x18   : > { %708 = vperm.xlu0 %1164, %v670_v11   ;;  %v674_v37 = vld [vmem:[%s1257_s7 + $0x28] sm:$0xff]  ;;  %v677_v40 = vld [vmem:[%s1257_s7 + $0x40] sm:$0xff]  ;;  %v1002_v44 = vld [vmem:[%s1293_s30 + $0x50] sm:$0xf]  ;;  %v971_v50 = vor.u32 %v1094_v42, %v970_v41 }
  0x19   : > { %718 = vperm.xlu1 %1165, %v672_v15   ;;  %v682_v43 = vld [vmem:[%s1257_s7 + $0x68] sm:$0xff]  ;;  %v1102_v45 = vld [vmem:[%s1293_s30 + $0x54] sm:$0xf0]  ;;  %v1093_v46 = vld [vmem:[%s1293_s30 + $0x14] sm:$0xf] }
  0x1a   : > { %539 = vmatpush.bf16.msra.mxu0 %v1111_v9  ;;  %1126 = vmatpush.bf16.msra.mxu2 %v1111_v9  ;;  %v972_v47 = vld [vmem:[%s1293_s30 + $0x18] sm:$0xf0]  ;;  %v1101_v48 = vld [vmem:[%s1293_s30 + $0x54] sm:$0xf]  ;;  %v1003_v51 = vor.u32 %v1102_v45, %v1002_v44  ;;  %v978_v57 = vld [vmem:[%s1293_s30 + $0x20] sm:$0xf] }
  0x1b   : > { %588 = vmatpush.bf16.msra.mxu1 %v1119_v10  ;;  %1134 = vmatpush.bf16.msra.mxu3 %v1119_v10  ;;  %v1004_v49 = vld [vmem:[%s1293_s30 + $0x58] sm:$0xf0]  ;;  %v975_v53 = vor.u32 %v1093_v46, %v972_v47  ;;  %v683_v56 = vld [vmem:[%s1257_s7 + $0x70] sm:$0xff]  ;;  %v1096_v58 = vld [vmem:[%s1293_s30 + $0x24] sm:$0xf0] }
  0x1c   : > { %728 = vperm.xlu2 %1166, %v674_v37   ;;  %v684_v52 = vld [vmem:[%s1257_s7 + $0x78] sm:$0xff]  ;;  %v1007_v54 = vor.u32 %v1101_v48, %v1004_v49  ;;  %v1010_v59 = vld [vmem:[%s1293_s30 + $0x60] sm:$0xf]  ;;  %v1104_v60 = vld [vmem:[%s1293_s30 + $0x64] sm:$0xf0]  ;;  %v979_v1 = vor.u32 %v1096_v58, %v978_v57 }
  0x1d   : > { %v680_v55 = vld [vmem:[%s1257_s7 + $0x58] sm:$0xff]  ;;  %v1095_v61 = vld [vmem:[%s1293_s30 + $0x24] sm:$0xf]  ;;  %v980_v62 = vld [vmem:[%s1293_s30 + $0x28] sm:$0xf0]  ;;  %v1011_v2 = vor.u32 %v1104_v60, %v1010_v59 }
  0x1e   : > { %540 = vmatpush.bf16.msra.mxu0 %v1110_v12  ;;  %1127 = vmatpush.bf16.msra.mxu2 %v1110_v12  ;;  %v1103_v63 = vld [vmem:[%s1293_s30 + $0x64] sm:$0xf]  ;;  %v1012_v0 = vld [vmem:[%s1293_s30 + $0x68] sm:$0xf0]  ;;  %v983_v3 = vor.u32 %v1095_v61, %v980_v62  ;;  %v986_v5 = vld [vmem:[%s1293_s30 + $0x30] sm:$0xf] }
  0x1f   : > { %589 = vmatpush.bf16.msra.mxu1 %v1118_v13  ;;  %1135 = vmatpush.bf16.msra.mxu3 %v1118_v13  ;;  %v1015_v4 = vor.u32 %v1103_v63, %v1012_v0  ;;  %v1098_v6 = vld [vmem:[%s1293_s30 + $0x34] sm:$0xf0]  ;;  %v1018_v7 = vld [vmem:[%s1293_s30 + $0x70] sm:$0xf]  ;;  %v1097_v9 = vld [vmem:[%s1293_s30 + $0x34] sm:$0xf] }
  0x20   : > { %733 = vperm.xlu0 %1164, %v675_v18   ;;  %v1106_v8 = vld [vmem:[%s1293_s30 + $0x74] sm:$0xf0]  ;;  %v988_v10 = vld [vmem:[%s1293_s30 + $0x38] sm:$0xf0]  ;;  %v1105_v11 = vld [vmem:[%s1293_s30 + $0x74] sm:$0xf]  ;;  %v987_v13 = vor.u32 %v1098_v6, %v986_v5 }
  0x21   : > { %738 = vperm.xlu1 %1165, %v676_v25   ;;  %v1020_v12 = vld [vmem:[%s1293_s30 + $0x78] sm:$0xf0]  ;;  %v991_v15 = vor.u32 %v1097_v9, %v988_v10  ;;  %v1353_v25 = vld [vmem:[%s1413_s3] ss:$0 sm:$0xff] }
  0x22   : > { %541 = vmatpush.bf16.msra.mxu0 %v1109_v14  ;;  %1128 = vmatpush.bf16.msra.mxu2 %v1109_v14  ;;  %v1019_v14 = vor.u32 %v1106_v8, %v1018_v7  ;;  %v1023_v16 = vor.u32 %v1105_v11, %v1020_v12 }
  0x23   : > { %590 = vmatpush.bf16.msra.mxu1 %v1117_v17  ;;  %1136 = vmatpush.bf16.msra.mxu3 %v1117_v17 }
  0x24   : > { %743 = vperm.xlu2 %1166, %v677_v40  }
  0x26   : > { %542 = vmatpush.bf16.msra.mxu0 %v1108_v19  ;;  %1129 = vmatpush.bf16.msra.mxu2 %v1108_v19 }
  0x27   : > { %591 = vmatpush.bf16.msra.mxu1 %v1116_v20  ;;  %1137 = vmatpush.bf16.msra.mxu3 %v1116_v20 }
  0x28   : > { %748 = vperm.xlu0 %1164, %v678_v34  }
  0x29   : > { %753 = vperm.xlu1 %1165, %v679_v38  }
  0x2a   : > { %543 = vmatpush.bf16.msra.mxu0 %v1107_v21  ;;  %1130 = vmatpush.bf16.msra.mxu2 %v1107_v21 }
  0x2b   : > { %592 = vmatpush.bf16.msra.mxu1 %v1115_v22  ;;  %1138 = vmatpush.bf16.msra.mxu3 %v1115_v22 }
  0x2c   : > { %758 = vperm.xlu2 %1166, %v680_v55  }
  0x2d   : > { %544 = vmatmul.bf16.vlgmr.msra.gmra.mxu0 %v963_v32  ;;  %564 = vmatmul.bf16.vlgmr.msra.gmra.mxu2 %v995_v33 }
  0x2e   : > { %593 = vmatmul.bf16.vlgmr.msra.gmra.mxu1 %v967_v35  ;;  %613 = vmatmul.bf16.vlgmr.msra.gmra.mxu3 %v999_v36 }
  0x30   : > { %763 = vperm.xlu0 %1164, %v681_v39  }
  0x31   : > { %768 = vperm.xlu1 %1165, %v682_v43  }
  0x34   : > { %773 = vperm.xlu2 %1166, %v683_v56  }
  0x38   : > { %778 = vperm.xlu0 %1164, %v684_v52  }
  0x3d   : > { %549 = vmatmul.bf16.gmra.mxu0 %v971_v50  ;;  %569 = vmatmul.bf16.gmra.mxu2 %v1003_v51 }
  0x3e   : > { %598 = vmatmul.bf16.gmra.mxu1 %v975_v53  ;;  %618 = vmatmul.bf16.gmra.mxu3 %v1007_v54 }
  0x4d   : > { %554 = vmatmul.bf16.gmra.mxu0 %v979_v1  ;;  %574 = vmatmul.bf16.gmra.mxu2 %v1011_v2 }
  0x4e   : > { %603 = vmatmul.bf16.gmra.mxu1 %v983_v3  ;;  %623 = vmatmul.bf16.gmra.mxu3 %v1015_v4 }
  0x5d   : > { %559 = vmatmul.bf16.gmra.mxu0 %v987_v13  ;;  %579 = vmatmul.bf16.gmra.mxu2 %v1019_v14 }
  0x5e   : > { %608 = vmatmul.bf16.gmra.mxu1 %v991_v15  ;;  %628 = vmatmul.bf16.gmra.mxu3 %v1023_v16 }
  0x6e   : > { %v1346_v17 = vpop.permute.xlu2 %723 }
  0x76   : > { %v1348_v20 = vpop.permute.xlu2 %728 }
  0x7e   : > { %v744_v30 = vpop.permute.xlu2 %743 }
  0x82   : > { %v704_v18 = vpop.permute.xlu0 %703 }
  0x83   : > { %v714_v19 = vpop.permute.xlu1 %713 }
  0x86   : > { %v759_v11 = vpop.permute.xlu2 %758 }
  0x8a   : > { %v709_v21 = vpop.permute.xlu0 %708 }
  0x8b   : > { %v719_v26 = vpop.permute.xlu1 %718 }
  0x92   : > { %v1362_v31 = vpop.permute.xlu0 %733 }
  0x93   : > { %v1366_v41 = vpop.permute.xlu1 %738 }
  0x9a   : > { %v749_v49 = vpop.permute.xlu0 %748 }
  0x9b   : > { %v754_v59 = vpop.permute.xlu1 %753 }
  0xaa   : > { %v545_v22 = vpop.f32.mrf.mxu0 }
  0xab   : > { %v594_v23 = vpop.f32.mrf.mxu1 }
  0xac   : > { %v595_v24 = vadd.f32 %v594_v23, %v545_v22 }
  0xae   : > { %v781_v27 = vmul.f32 %v704_v18, %v595_v24 }
  0xb0   : > { %v801_v28 = vadd.f32 %v1353_v25, %v781_v27  ;;  %v565_v29 = vpop.f32.mrf.mxu2  ;;  %v764_v27 = vpop.permute.xlu0 %763 }
  0xb1   : > { %v614_v32 = vpop.f32.mrf.mxu3 }
  0xb2   : > { %v817_v33 = vmax.f32 %v801_v28, 0.0  ;;  %v615_v34 = vadd.f32 %v614_v32, %v565_v29  ;;  %v547_v35 = vpop.f32.mrf.mxu0 }
  0xb3   : > { %v596_v36 = vpop.f32.mrf.mxu1 }
  0xb4   : > { %833 = vst [vmem:[%s1360_s15] sm:$0xff] %v817_v33  ;;  %v789_v37 = vmul.f32 %v744_v30, %v615_v34  ;;  %v597_v38 = vadd.f32 %v596_v36, %v547_v35 }
  0xb6   : > { %v809_v39 = vadd.f32 %v1353_v25, %v789_v37  ;;  %v782_v40 = vmul.f32 %v709_v21, %v597_v38 }
  0xb8   : > { %v825_v42 = vmax.f32 %v809_v39, 0.0  ;;  %v802_v43 = vadd.f32 %v1353_v25, %v782_v40  ;;  %v567_v44 = vpop.f32.mrf.mxu2  ;;  %v769_v40 = vpop.permute.xlu1 %768 }
  0xb9   : > { %v616_v45 = vpop.f32.mrf.mxu3 }
  0xba   : > { %841 = vst [vmem:[%s1360_s15 + $0x40] sm:$0xff] %v825_v42  ;;  %v818_v46 = vmax.f32 %v802_v43, 0.0  ;;  %v617_v47 = vadd.f32 %v616_v45, %v567_v44  ;;  %v550_v48 = vpop.f32.mrf.mxu0 }
  0xbb   : > { %v599_v50 = vpop.f32.mrf.mxu1 }
  0xbc   : > { %834 = vst [vmem:[%s1360_s15 + $0x8] sm:$0xff] %v818_v46  ;;  %v790_v51 = vmul.f32 %v749_v49, %v617_v47  ;;  %v600_v52 = vadd.f32 %v599_v50, %v550_v48 }
  0xbe   : > { %v810_v53 = vadd.f32 %v1353_v25, %v790_v51  ;;  %v783_v54 = vmul.f32 %v714_v19, %v600_v52 }
  0xc0   : > { %v826_v55 = vmax.f32 %v810_v53, 0.0  ;;  %v803_v56 = vadd.f32 %v1353_v25, %v783_v54  ;;  %v570_v57 = vpop.f32.mrf.mxu2  ;;  %v774_v53 = vpop.permute.xlu2 %773 }
  0xc1   : > { %v619_v58 = vpop.f32.mrf.mxu3 }
  0xc2   : > { %842 = vst [vmem:[%s1360_s15 + $0x48] sm:$0xff] %v826_v55  ;;  %v819_v60 = vmax.f32 %v803_v56, 0.0  ;;  %v620_v61 = vadd.f32 %v619_v58, %v570_v57  ;;  %v552_v62 = vpop.f32.mrf.mxu0 }
  0xc3   : > { %v601_v63 = vpop.f32.mrf.mxu1 }
  0xc4   : > { %835 = vst [vmem:[%s1360_s15 + $0x10] sm:$0xff] %v819_v60  ;;  %v791_v0 = vmul.f32 %v754_v59, %v620_v61  ;;  %v602_v1 = vadd.f32 %v601_v63, %v552_v62 }
  0xc6   : > { %v811_v2 = vadd.f32 %v1353_v25, %v791_v0  ;;  %v784_v3 = vmul.f32 %v719_v26, %v602_v1  ;;  %v779_v0 = vpop.permute.xlu0 %778 }
  0xc8   : > { %v827_v4 = vmax.f32 %v811_v2, 0.0  ;;  %v804_v5 = vadd.f32 %v1353_v25, %v784_v3  ;;  %v572_v6 = vpop.f32.mrf.mxu2 }
  0xc9   : > { %v621_v7 = vpop.f32.mrf.mxu3 }
  0xca   : > { %843 = vst [vmem:[%s1360_s15 + $0x50] sm:$0xff] %v827_v4  ;;  %v820_v8 = vmax.f32 %v804_v5, 0.0  ;;  %v622_v9 = vadd.f32 %v621_v7, %v572_v6  ;;  %v555_v10 = vpop.f32.mrf.mxu0 }
  0xcb   : > { %v604_v12 = vpop.f32.mrf.mxu1 }
  0xcc   : > { %836 = vst [vmem:[%s1360_s15 + $0x18] sm:$0xff] %v820_v8  ;;  %v792_v13 = vmul.f32 %v759_v11, %v622_v9  ;;  %v605_v14 = vadd.f32 %v604_v12, %v555_v10 }
  0xce   : > { %v812_v15 = vadd.f32 %v1353_v25, %v792_v13  ;;  %v785_v16 = vmul.f32 %v1346_v17, %v605_v14 }
  0xd0   : > { %v828_v18 = vmax.f32 %v812_v15, 0.0  ;;  %v805_v19 = vadd.f32 %v1353_v25, %v785_v16  ;;  %v575_v21 = vpop.f32.mrf.mxu2 }
  0xd1   : > { %v624_v22 = vpop.f32.mrf.mxu3 }
  0xd2   : > { %844 = vst [vmem:[%s1360_s15 + $0x58] sm:$0xff] %v828_v18  ;;  %v821_v23 = vmax.f32 %v805_v19, 0.0  ;;  %v625_v24 = vadd.f32 %v624_v22, %v575_v21  ;;  %v557_v26 = vpop.f32.mrf.mxu0 }
  0xd3   : > { %v606_v28 = vpop.f32.mrf.mxu1 }
  0xd4   : > { %837 = vst [vmem:[%s1360_s15 + $0x20] sm:$0xff] %v821_v23  ;;  %v793_v29 = vmul.f32 %v764_v27, %v625_v24  ;;  %v607_v30 = vadd.f32 %v606_v28, %v557_v26 }
  0xd6   : > { %v813_v32 = vadd.f32 %v1353_v25, %v793_v29  ;;  %v786_v17 = vmul.f32 %v1348_v20, %v607_v30 }
  0xd8   : > { %v829_v33 = vmax.f32 %v813_v32, 0.0  ;;  %v806_v34 = vadd.f32 %v1353_v25, %v786_v17  ;;  %v577_v35 = vpop.f32.mrf.mxu2 }
  0xd9   : > { %v626_v36 = vpop.f32.mrf.mxu3 }
  0xda   : > { %845 = vst [vmem:[%s1360_s15 + $0x60] sm:$0xff] %v829_v33  ;;  %v822_v37 = vmax.f32 %v806_v34, 0.0  ;;  %v627_v38 = vadd.f32 %v626_v36, %v577_v35  ;;  %v560_v39 = vpop.f32.mrf.mxu0 }
  0xdb   : > { %v609_v42 = vpop.f32.mrf.mxu1 }
  0xdc   : > { %838 = vst [vmem:[%s1360_s15 + $0x28] sm:$0xff] %v822_v37  ;;  %v794_v43 = vmul.f32 %v769_v40, %v627_v38  ;;  %v610_v44 = vadd.f32 %v609_v42, %v560_v39 }
  0xde   : > { %v814_v45 = vadd.f32 %v1353_v25, %v794_v43  ;;  %v787_v20 = vmul.f32 %v1362_v31, %v610_v44 }
  0xe0   : > { %v830_v46 = vmax.f32 %v814_v45, 0.0  ;;  %v807_v47 = vadd.f32 %v1353_v25, %v787_v20  ;;  %v580_v48 = vpop.f32.mrf.mxu2 }
  0xe1   : > { %v629_v49 = vpop.f32.mrf.mxu3 }
  0xe2   : > { %846 = vst [vmem:[%s1360_s15 + $0x68] sm:$0xff] %v830_v46  ;;  %v823_v50 = vmax.f32 %v807_v47, 0.0  ;;  %v630_v51 = vadd.f32 %v629_v49, %v580_v48  ;;  %v562_v52 = vpop.f32.mrf.mxu0 }
  0xe3   : > { %v611_v54 = vpop.f32.mrf.mxu1 }
  0xe4   : > { %839 = vst [vmem:[%s1360_s15 + $0x30] sm:$0xff] %v823_v50  ;;  %v795_v55 = vmul.f32 %v774_v53, %v630_v51  ;;  %v612_v56 = vadd.f32 %v611_v54, %v562_v52 }
  0xe6   : > { %v815_v57 = vadd.f32 %v1353_v25, %v795_v55  ;;  %v788_v31 = vmul.f32 %v1366_v41, %v612_v56 }
  0xe8   : > { %v831_v58 = vmax.f32 %v815_v57, 0.0  ;;  %v808_v59 = vadd.f32 %v1353_v25, %v788_v31  ;;  %v582_v60 = vpop.f32.mrf.mxu2 }
  0xe9   : > { %v631_v61 = vpop.f32.mrf.mxu3 }
  0xea   : > { %847 = vst [vmem:[%s1360_s15 + $0x70] sm:$0xff] %v831_v58  ;;  %v824_v62 = vmax.f32 %v808_v59, 0.0  ;;  %v632_v63 = vadd.f32 %v631_v61, %v582_v60 }
  0xec   : > { %840 = vst [vmem:[%s1360_s15 + $0x38] sm:$0xff] %v824_v62  ;;  %v796_v1 = vmul.f32 %v779_v0, %v632_v63 }
  0xee   : > { %v816_v2 = vadd.f32 %v1353_v25, %v796_v1 }
  0xf0   : > { %v832_v3 = vmax.f32 %v816_v2, 0.0 }
  0xf2   : > { %848 = vst [vmem:[%s1360_s15 + $0x78] sm:$0xff] %v832_v3 }
  0xf3 PF: > { %s14_s17 = sadd.s32 1, %s1190_s17   ;;  %s1415_s15 = smov %s1186_s16 }
  0xf4   : > { %p11_p5 = scmp.ge.s32.totalorder %s14_s17, 4   ;;  %s1416_s16 = smov %s1418_s18 }
  0xf6   :  { %13 = sbr.rel (!%p11_p5) target bundleno = 2 (0x2), region = 80 }

// kernel: gnn_feature_extractor.2
= control target key start
LH: loop header
LB: loop body
LE: loop exit
PB: predicated region body
PF: predicated region fallthrough
CT: control target
= control target key end

     0   :  { %s1281_s15 = smov 0   ;;  %s1283_s16 = smov 0   ;;  %s1468_s0 = inlined_call_operand.vmem [shape: bf16[256,256], index: 0, kind: input, shape index: {}]   ;;  %s1469_s1 = inlined_call_operand.vmem [shape: bf16[256,128], index: 1, kind: input, shape index: {}]   ;;  %s1470_s2 = inlined_call_operand.vmem [shape: f32[256,1], index: 2, kind: input, shape index: {}]   ;;  %s1471_s3 = inlined_call_operand.vmem [shape: f32[1,128], index: 3, kind: input, shape index: {}]   ;;  %s1472_s4 = inlined_call_operand.vmem [shape: bf16[256,128], index: 4, kind: output, shape index: {}]  }
   0x1   :  { %s1285_s17 = smov 0  }
   0x2 LB: > { %s26_s18 = sadd.s32 1, %s1249_s16  ;;  %p968_p0 = scmp.ge.s32.totalorder %s1253_s17, 1  ;;  %s1253_s17 = sphi %s1285_s17, %s14_s17   ;;  %s1249_s16 = sphi %s1283_s16, %s1474_s16   ;;  %s1245_s15 = sphi %s1281_s15, %s1473_s15  }
   0x3   : > { %p28_p1 = scmp.ge.s32.totalorder %s26_s18, 2  ;;  %p205_p2 = scmp.lt.s32.totalorder %s1253_s17, 3 }
   0x5   : > { %s1476_s18 = smov (%p28_p1, %s26_s18), 0  ;;  %p206_p3 = pnand %p968_p0, %p205_p2 }
   0x6   : > { %s969_s23 = sshll.u32 (!%p206_p3), %s1245_s15, 4 }
   0x7   : > { %209 = sbr.rel (%p206_p3) target bundleno = 245 (0xf5), region = 36  ;;  %p248_p4 = scmp.lt.s32.totalorder (!%p206_p3), %s969_s23, 31 }
   0xc   : > { %v1130_v0 = vld [vmem:[%s1469_s1 + $0x38] sm:$0xff]  ;;  %v1255_v2 = vmov 0   ;;  %v1129_v3 = vld [vmem:[%s1469_s1 + $0x30] sm:$0xff]  ;;  %s1478_s23 = smov (!%p248_p4, %s969_s23), 31  ;;  %v1128_v5 = vld [vmem:[%s1469_s1 + $0x28] sm:$0xff] }
   0xd   : > { %v1138_v1 = vld [vmem:[%s1469_s1 + $0x78] sm:$0xff]  ;;  %1227 = vset.pattern.permute.xlu0 %v1255_v2  ;;  %1228 = vset.pattern.permute.xlu1 %v1255_v2  ;;  %v1137_v4 = vld [vmem:[%s1469_s1 + $0x70] sm:$0xff]  ;;  %s1106_s28 = sshll.u32 %s1478_s23, 3  ;;  %v1136_v6 = vld [vmem:[%s1469_s1 + $0x68] sm:$0xff]  ;;  %s975_s13 = sshll.u32 %s1478_s23, 2 }
   0xe   : > { %536 = vmatpush.bf16.msra.mxu0 %v1130_v0  ;;  %1186 = vmatpush.bf16.msra.mxu2 %v1130_v0  ;;  %s1322_s7 = scalar_lea.vmem %s1470_s2, %s1106_s28  ;;  %v1127_v8 = vld [vmem:[%s1469_s1 + $0x20] sm:$0xff]  ;;  %v1126_v12 = vld [vmem:[%s1469_s1 + $0x18] sm:$0xff]  ;;  %v1125_v14 = vld [vmem:[%s1469_s1 + $0x10] sm:$0xff]  ;;  %s1359_s5 = scalar_lea.vmem %s1468_s0, %s1106_s28 }
   0xf   : > { %585 = vmatpush.bf16.msra.mxu1 %v1138_v1  ;;  %1194 = vmatpush.bf16.msra.mxu3 %v1138_v1  ;;  %v669_v7 = vld [vmem:[%s1322_s7] sm:$0xff]  ;;  %v671_v9 = vld [vmem:[%s1322_s7 + $0x10] sm:$0xff]  ;;  %v670_v11 = vld [vmem:[%s1322_s7 + $0x8] sm:$0xff]  ;;  %s1431_s19 = scalar_lea.vmem %s1472_s4, %s975_s13 }
  0x10   : > { %1229 = vset.pattern.permute.xlu2 %v1255_v2  ;;  %703 = vperm.xlu0 %1227, %v669_v7   ;;  %v1135_v10 = vld [vmem:[%s1469_s1 + $0x60] sm:$0xff]  ;;  %v1134_v13 = vld [vmem:[%s1469_s1 + $0x58] sm:$0xff]  ;;  %v1133_v17 = vld [vmem:[%s1469_s1 + $0x50] sm:$0xff] }
  0x11   : > { %713 = vperm.xlu1 %1228, %v671_v9   ;;  %v672_v15 = vld [vmem:[%s1322_s7 + $0x18] sm:$0xff]  ;;  %v673_v16 = vld [vmem:[%s1322_s7 + $0x20] sm:$0xff]  ;;  %v675_v18 = vld [vmem:[%s1322_s7 + $0x30] sm:$0xff] }
  0x12   : > { %537 = vmatpush.bf16.msra.mxu0 %v1129_v3  ;;  %1187 = vmatpush.bf16.msra.mxu2 %v1129_v3  ;;  %v1124_v19 = vld [vmem:[%s1469_s1 + $0x8] sm:$0xff]  ;;  %v1123_v21 = vld [vmem:[%s1469_s1] sm:$0xff]  ;;  %v676_v25 = vld [vmem:[%s1322_s7 + $0x38] sm:$0xff] }
  0x13   : > { %586 = vmatpush.bf16.msra.mxu1 %v1137_v4  ;;  %1195 = vmatpush.bf16.msra.mxu3 %v1137_v4  ;;  %v1132_v20 = vld [vmem:[%s1469_s1 + $0x48] sm:$0xff]  ;;  %v1131_v22 = vld [vmem:[%s1469_s1 + $0x40] sm:$0xff]  ;;  %v679_v38 = vld [vmem:[%s1322_s7 + $0x50] sm:$0xff] }
  0x14   : > { %723 = vperm.xlu2 %1229, %v673_v16   ;;  %v978_v23 = vld [vmem:[%s1359_s5] sm:$0xf]  ;;  %v1108_v24 = vld [vmem:[%s1359_s5 + $0x4] sm:$0xf0]  ;;  %v1107_v28 = vld [vmem:[%s1359_s5 + $0x4] sm:$0xf] }
  0x15   : > { %v1010_v26 = vld [vmem:[%s1359_s5 + $0x40] sm:$0xf]  ;;  %v1116_v27 = vld [vmem:[%s1359_s5 + $0x44] sm:$0xf0]  ;;  %v980_v29 = vld [vmem:[%s1359_s5 + $0x8] sm:$0xf0]  ;;  %v979_v32 = vor.u32 %v1108_v24, %v978_v23 }
  0x16   : > { %538 = vmatpush.bf16.msra.mxu0 %v1128_v5  ;;  %1188 = vmatpush.bf16.msra.mxu2 %v1128_v5  ;;  %v1115_v30 = vld [vmem:[%s1359_s5 + $0x44] sm:$0xf]  ;;  %v1012_v31 = vld [vmem:[%s1359_s5 + $0x48] sm:$0xf0]  ;;  %v1011_v33 = vor.u32 %v1116_v27, %v1010_v26  ;;  %v983_v35 = vor.u32 %v1107_v28, %v980_v29  ;;  %v986_v41 = vld [vmem:[%s1359_s5 + $0x10] sm:$0xf] }
  0x17   : > { %587 = vmatpush.bf16.msra.mxu1 %v1136_v6  ;;  %1196 = vmatpush.bf16.msra.mxu3 %v1136_v6  ;;  %v678_v34 = vld [vmem:[%s1322_s7 + $0x48] sm:$0xff]  ;;  %v1015_v36 = vor.u32 %v1115_v30, %v1012_v31  ;;  %v681_v39 = vld [vmem:[%s1322_s7 + $0x60] sm:$0xff]  ;;  %v1110_v42 = vld [vmem:[%s1359_s5 + $0x14] sm:$0xf0] }
  0x18   : > { %708 = vperm.xlu0 %1227, %v670_v11   ;;  %v674_v37 = vld [vmem:[%s1322_s7 + $0x28] sm:$0xff]  ;;  %v677_v40 = vld [vmem:[%s1322_s7 + $0x40] sm:$0xff]  ;;  %v1018_v44 = vld [vmem:[%s1359_s5 + $0x50] sm:$0xf]  ;;  %v987_v50 = vor.u32 %v1110_v42, %v986_v41 }
  0x19   : > { %718 = vperm.xlu1 %1228, %v672_v15   ;;  %v682_v43 = vld [vmem:[%s1322_s7 + $0x68] sm:$0xff]  ;;  %v1118_v45 = vld [vmem:[%s1359_s5 + $0x54] sm:$0xf0]  ;;  %v1109_v46 = vld [vmem:[%s1359_s5 + $0x14] sm:$0xf] }
  0x1a   : > { %539 = vmatpush.bf16.msra.mxu0 %v1127_v8  ;;  %1189 = vmatpush.bf16.msra.mxu2 %v1127_v8  ;;  %v988_v47 = vld [vmem:[%s1359_s5 + $0x18] sm:$0xf0]  ;;  %v1117_v48 = vld [vmem:[%s1359_s5 + $0x54] sm:$0xf]  ;;  %v1019_v51 = vor.u32 %v1118_v45, %v1018_v44  ;;  %v994_v57 = vld [vmem:[%s1359_s5 + $0x20] sm:$0xf] }
  0x1b   : > { %588 = vmatpush.bf16.msra.mxu1 %v1135_v10  ;;  %1197 = vmatpush.bf16.msra.mxu3 %v1135_v10  ;;  %v1020_v49 = vld [vmem:[%s1359_s5 + $0x58] sm:$0xf0]  ;;  %v991_v53 = vor.u32 %v1109_v46, %v988_v47  ;;  %v683_v56 = vld [vmem:[%s1322_s7 + $0x70] sm:$0xff]  ;;  %v1112_v58 = vld [vmem:[%s1359_s5 + $0x24] sm:$0xf0] }
  0x1c   : > { %728 = vperm.xlu2 %1229, %v674_v37   ;;  %v684_v52 = vld [vmem:[%s1322_s7 + $0x78] sm:$0xff]  ;;  %v1023_v54 = vor.u32 %v1117_v48, %v1020_v49  ;;  %v1026_v59 = vld [vmem:[%s1359_s5 + $0x60] sm:$0xf]  ;;  %v1120_v60 = vld [vmem:[%s1359_s5 + $0x64] sm:$0xf0]  ;;  %v995_v1 = vor.u32 %v1112_v58, %v994_v57 }
  0x1d   : > { %v680_v55 = vld [vmem:[%s1322_s7 + $0x58] sm:$0xff]  ;;  %v1111_v61 = vld [vmem:[%s1359_s5 + $0x24] sm:$0xf]  ;;  %v996_v62 = vld [vmem:[%s1359_s5 + $0x28] sm:$0xf0]  ;;  %v1027_v2 = vor.u32 %v1120_v60, %v1026_v59 }
  0x1e   : > { %540 = vmatpush.bf16.msra.mxu0 %v1126_v12  ;;  %1190 = vmatpush.bf16.msra.mxu2 %v1126_v12  ;;  %v1119_v63 = vld [vmem:[%s1359_s5 + $0x64] sm:$0xf]  ;;  %v1028_v0 = vld [vmem:[%s1359_s5 + $0x68] sm:$0xf0]  ;;  %v999_v3 = vor.u32 %v1111_v61, %v996_v62  ;;  %v1002_v5 = vld [vmem:[%s1359_s5 + $0x30] sm:$0xf] }
  0x1f   : > { %589 = vmatpush.bf16.msra.mxu1 %v1134_v13  ;;  %1198 = vmatpush.bf16.msra.mxu3 %v1134_v13  ;;  %v1031_v4 = vor.u32 %v1119_v63, %v1028_v0  ;;  %v1114_v6 = vld [vmem:[%s1359_s5 + $0x34] sm:$0xf0]  ;;  %v1034_v7 = vld [vmem:[%s1359_s5 + $0x70] sm:$0xf]  ;;  %v1113_v9 = vld [vmem:[%s1359_s5 + $0x34] sm:$0xf] }
  0x20   : > { %733 = vperm.xlu0 %1227, %v675_v18   ;;  %v1122_v8 = vld [vmem:[%s1359_s5 + $0x74] sm:$0xf0]  ;;  %v1004_v10 = vld [vmem:[%s1359_s5 + $0x38] sm:$0xf0]  ;;  %v1121_v11 = vld [vmem:[%s1359_s5 + $0x74] sm:$0xf]  ;;  %v1003_v13 = vor.u32 %v1114_v6, %v1002_v5 }
  0x21   : > { %738 = vperm.xlu1 %1228, %v676_v25   ;;  %v1036_v12 = vld [vmem:[%s1359_s5 + $0x78] sm:$0xf0]  ;;  %v1007_v15 = vor.u32 %v1113_v9, %v1004_v10  ;;  %v1421_v30 = vld [vmem:[%s1471_s3] ss:$0 sm:$0xff] }
  0x22   : > { %541 = vmatpush.bf16.msra.mxu0 %v1125_v14  ;;  %1191 = vmatpush.bf16.msra.mxu2 %v1125_v14  ;;  %v1035_v14 = vor.u32 %v1122_v8, %v1034_v7  ;;  %v1039_v16 = vor.u32 %v1121_v11, %v1036_v12 }
  0x23   : > { %590 = vmatpush.bf16.msra.mxu1 %v1133_v17  ;;  %1199 = vmatpush.bf16.msra.mxu3 %v1133_v17 }
  0x24   : > { %743 = vperm.xlu2 %1229, %v677_v40  }
  0x26   : > { %542 = vmatpush.bf16.msra.mxu0 %v1124_v19  ;;  %1192 = vmatpush.bf16.msra.mxu2 %v1124_v19 }
  0x27   : > { %591 = vmatpush.bf16.msra.mxu1 %v1132_v20  ;;  %1200 = vmatpush.bf16.msra.mxu3 %v1132_v20 }
  0x28   : > { %748 = vperm.xlu0 %1227, %v678_v34  }
  0x29   : > { %753 = vperm.xlu1 %1228, %v679_v38  }
  0x2a   : > { %543 = vmatpush.bf16.msra.mxu0 %v1123_v21  ;;  %1193 = vmatpush.bf16.msra.mxu2 %v1123_v21 }
  0x2b   : > { %592 = vmatpush.bf16.msra.mxu1 %v1131_v22  ;;  %1201 = vmatpush.bf16.msra.mxu3 %v1131_v22 }
  0x2c   : > { %758 = vperm.xlu2 %1229, %v680_v55  }
  0x2d   : > { %544 = vmatmul.bf16.vlgmr.msra.gmra.mxu0 %v979_v32  ;;  %564 = vmatmul.bf16.vlgmr.msra.gmra.mxu2 %v1011_v33 }
  0x2e   : > { %593 = vmatmul.bf16.vlgmr.msra.gmra.mxu1 %v983_v35  ;;  %613 = vmatmul.bf16.vlgmr.msra.gmra.mxu3 %v1015_v36 }
  0x30   : > { %763 = vperm.xlu0 %1227, %v681_v39  }
  0x31   : > { %768 = vperm.xlu1 %1228, %v682_v43  }
  0x34   : > { %773 = vperm.xlu2 %1229, %v683_v56  }
  0x38   : > { %778 = vperm.xlu0 %1227, %v684_v52  }
  0x3d   : > { %549 = vmatmul.bf16.gmra.mxu0 %v987_v50  ;;  %569 = vmatmul.bf16.gmra.mxu2 %v1019_v51 }
  0x3e   : > { %598 = vmatmul.bf16.gmra.mxu1 %v991_v53  ;;  %618 = vmatmul.bf16.gmra.mxu3 %v1023_v54 }
  0x4d   : > { %554 = vmatmul.bf16.gmra.mxu0 %v995_v1  ;;  %574 = vmatmul.bf16.gmra.mxu2 %v1027_v2 }
  0x4e   : > { %603 = vmatmul.bf16.gmra.mxu1 %v999_v3  ;;  %623 = vmatmul.bf16.gmra.mxu3 %v1031_v4 }
  0x5d   : > { %559 = vmatmul.bf16.gmra.mxu0 %v1003_v13  ;;  %579 = vmatmul.bf16.gmra.mxu2 %v1035_v14 }
  0x5e   : > { %608 = vmatmul.bf16.gmra.mxu1 %v1007_v15  ;;  %628 = vmatmul.bf16.gmra.mxu3 %v1039_v16 }
  0x6e   : > { %v1412_v18 = vpop.permute.xlu2 %723 }
  0x76   : > { %v1414_v22 = vpop.permute.xlu2 %728 }
  0x7e   : > { %v744_v35 = vpop.permute.xlu2 %743 }
  0x82   : > { %v704_v17 = vpop.permute.xlu0 %703 }
  0x83   : > { %v714_v19 = vpop.permute.xlu1 %713 }
  0x86   : > { %v759_v11 = vpop.permute.xlu2 %758 }
  0x8a   : > { %v709_v20 = vpop.permute.xlu0 %708 }
  0x8b   : > { %v719_v26 = vpop.permute.xlu1 %718 }
  0x92   : > { %v1416_v27 = vpop.permute.xlu0 %733 }
  0x93   : > { %v1426_v45 = vpop.permute.xlu1 %738 }
  0x9a   : > { %v749_v47 = vpop.permute.xlu0 %748 }
  0x9b   : > { %v754_v0 = vpop.permute.xlu1 %753 }
  0xaa   : > { %v545_v21 = vpop.f32.mrf.mxu0 }
  0xab   : > { %v594_v23 = vpop.f32.mrf.mxu1 }
  0xac   : > { %v595_v24 = vadd.f32 %v594_v23, %v545_v21 }
  0xae   : > { %v781_v29 = vmul.f32 %v704_v17, %v595_v24 }
  0xb0   : > { %v565_v25 = vpop.f32.mrf.mxu2  ;;  %v801_v36 = vadd.f32 %v1421_v30, %v781_v29 }
  0xb1   : > { %v614_v28 = vpop.f32.mrf.mxu3 }
  0xb2   : > { %v547_v31 = vpop.f32.mrf.mxu0  ;;  %v615_v33 = vadd.f32 %v614_v28, %v565_v25  ;;  %v817_v42 = vmax.f32 %v801_v36, 0.0 }
  0xb3   : > { %v596_v32 = vpop.f32.mrf.mxu1 }
  0xb4   : > { %v597_v34 = vadd.f32 %v596_v32, %v547_v31  ;;  %v789_v38 = vmul.f32 %v744_v35, %v615_v33 }
  0xb6   : > { %v782_v37 = vmul.f32 %v709_v20, %v597_v34  ;;  %v809_v49 = vadd.f32 %v1421_v30, %v789_v38  ;;  %v764_v34 = vpop.permute.xlu0 %763 }
  0xb8   : > { %v802_v39 = vadd.f32 %v1421_v30, %v782_v37  ;;  %v567_v40 = vpop.f32.mrf.mxu2  ;;  %v825_v54 = vmax.f32 %v809_v49, 0.0 }
  0xb9   : > { %v616_v41 = vpop.f32.mrf.mxu3 }
  0xba   : > { %v818_v43 = vmax.f32 %v802_v39, 0.0  ;;  %v617_v44 = vadd.f32 %v616_v41, %v567_v40  ;;  %v550_v46 = vpop.f32.mrf.mxu0 }
  0xbb   : > { %v599_v48 = vpop.f32.mrf.mxu1 }
  0xbc   : > { %v1142_v50 = vpack.c.bf16 %v818_v43, %v817_v42  ;;  %v790_v51 = vmul.f32 %v749_v47, %v617_v44  ;;  %v600_v53 = vadd.f32 %v599_v48, %v550_v46  ;;  %v769_v42 = vpop.permute.xlu1 %768 }
  0xbe   : > { %1143 = vst [vmem:[%s1431_s19] sm:$0xff] %v1142_v50   ;;  %v810_v52 = vadd.f32 %v1421_v30, %v790_v51  ;;  %v783_v59 = vmul.f32 %v714_v19, %v600_v53 }
  0xc0   : > { %v826_v55 = vmax.f32 %v810_v52, 0.0  ;;  %v570_v56 = vpop.f32.mrf.mxu2  ;;  %v803_v1 = vadd.f32 %v1421_v30, %v783_v59 }
  0xc1   : > { %v619_v57 = vpop.f32.mrf.mxu3 }
  0xc2   : > { %v1162_v58 = vpack.c.bf16 %v826_v55, %v825_v54  ;;  %v552_v60 = vpop.f32.mrf.mxu0  ;;  %v620_v62 = vadd.f32 %v619_v57, %v570_v56  ;;  %v819_v7 = vmax.f32 %v803_v1, 0.0 }
  0xc3   : > { %v601_v61 = vpop.f32.mrf.mxu1 }
  0xc4   : > { %1182 = vst [vmem:[%s1431_s19 + $0x20] sm:$0xff] %v1162_v58   ;;  %v602_v63 = vadd.f32 %v601_v61, %v552_v60  ;;  %v791_v3 = vmul.f32 %v754_v0, %v620_v62  ;;  %v774_v61 = vpop.permute.xlu2 %773 }
  0xc6   : > { %v784_v2 = vmul.f32 %v719_v26, %v602_v63  ;;  %v811_v13 = vadd.f32 %v1421_v30, %v791_v3 }
  0xc8   : > { %v804_v4 = vadd.f32 %v1421_v30, %v784_v2  ;;  %v572_v5 = vpop.f32.mrf.mxu2  ;;  %v827_v19 = vmax.f32 %v811_v13, 0.0 }
  0xc9   : > { %v621_v6 = vpop.f32.mrf.mxu3 }
  0xca   : > { %v820_v8 = vmax.f32 %v804_v4, 0.0  ;;  %v622_v9 = vadd.f32 %v621_v6, %v572_v5  ;;  %v555_v10 = vpop.f32.mrf.mxu0  ;;  %v779_v4 = vpop.permute.xlu0 %778 }
  0xcb   : > { %v604_v12 = vpop.f32.mrf.mxu1 }
  0xcc   : > { %v1147_v14 = vpack.c.bf16 %v820_v8, %v819_v7  ;;  %v792_v15 = vmul.f32 %v759_v11, %v622_v9  ;;  %v605_v17 = vadd.f32 %v604_v12, %v555_v10 }
  0xce   : > { %1179 = vst [vmem:[%s1431_s19 + $0x8] sm:$0xff] %v1147_v14   ;;  %v812_v16 = vadd.f32 %v1421_v30, %v792_v15  ;;  %v785_v25 = vmul.f32 %v1412_v18, %v605_v17 }
  0xd0   : > { %v828_v20 = vmax.f32 %v812_v16, 0.0  ;;  %v575_v21 = vpop.f32.mrf.mxu2  ;;  %v805_v32 = vadd.f32 %v1421_v30, %v785_v25 }
  0xd1   : > { %v624_v23 = vpop.f32.mrf.mxu3 }
  0xd2   : > { %v1167_v24 = vpack.c.bf16 %v828_v20, %v827_v19  ;;  %v557_v26 = vpop.f32.mrf.mxu0  ;;  %v625_v29 = vadd.f32 %v624_v23, %v575_v21  ;;  %v821_v39 = vmax.f32 %v805_v32, 0.0 }
  0xd3   : > { %v606_v28 = vpop.f32.mrf.mxu1 }
  0xd4   : > { %1183 = vst [vmem:[%s1431_s19 + $0x28] sm:$0xff] %v1167_v24   ;;  %v607_v31 = vadd.f32 %v606_v28, %v557_v26  ;;  %v793_v35 = vmul.f32 %v764_v34, %v625_v29 }
  0xd6   : > { %v786_v33 = vmul.f32 %v1414_v22, %v607_v31  ;;  %v813_v44 = vadd.f32 %v1421_v30, %v793_v35 }
  0xd8   : > { %v806_v36 = vadd.f32 %v1421_v30, %v786_v33  ;;  %v577_v37 = vpop.f32.mrf.mxu2  ;;  %v829_v49 = vmax.f32 %v813_v44, 0.0 }
  0xd9   : > { %v626_v38 = vpop.f32.mrf.mxu3 }
  0xda   : > { %v822_v40 = vmax.f32 %v806_v36, 0.0  ;;  %v627_v41 = vadd.f32 %v626_v38, %v577_v37  ;;  %v560_v18 = vpop.f32.mrf.mxu0 }
  0xdb   : > { %v609_v43 = vpop.f32.mrf.mxu1 }
  0xdc   : > { %v1152_v46 = vpack.c.bf16 %v822_v40, %v821_v39  ;;  %v794_v47 = vmul.f32 %v769_v42, %v627_v41  ;;  %v610_v48 = vadd.f32 %v609_v43, %v560_v18 }
  0xde   : > { %1180 = vst [vmem:[%s1431_s19 + $0x10] sm:$0xff] %v1152_v46   ;;  %v814_v22 = vadd.f32 %v1421_v30, %v794_v47  ;;  %v787_v54 = vmul.f32 %v1416_v27, %v610_v48 }
  0xe0   : > { %v830_v50 = vmax.f32 %v814_v22, 0.0  ;;  %v580_v51 = vpop.f32.mrf.mxu2  ;;  %v807_v59 = vadd.f32 %v1421_v30, %v787_v54 }
  0xe1   : > { %v629_v52 = vpop.f32.mrf.mxu3 }
  0xe2   : > { %v1172_v53 = vpack.c.bf16 %v830_v50, %v829_v49  ;;  %v562_v55 = vpop.f32.mrf.mxu0  ;;  %v630_v57 = vadd.f32 %v629_v52, %v580_v51  ;;  %v823_v2 = vmax.f32 %v807_v59, 0.0 }
  0xe3   : > { %v611_v56 = vpop.f32.mrf.mxu1 }
  0xe4   : > { %1184 = vst [vmem:[%s1431_s19 + $0x30] sm:$0xff] %v1172_v53   ;;  %v612_v58 = vadd.f32 %v611_v56, %v562_v55  ;;  %v795_v62 = vmul.f32 %v774_v61, %v630_v57 }
  0xe6   : > { %v788_v60 = vmul.f32 %v1426_v45, %v612_v58  ;;  %v815_v5 = vadd.f32 %v1421_v30, %v795_v62 }
  0xe8   : > { %v808_v63 = vadd.f32 %v1421_v30, %v788_v60  ;;  %v582_v0 = vpop.f32.mrf.mxu2  ;;  %v831_v9 = vmax.f32 %v815_v5, 0.0 }
  0xe9   : > { %v631_v1 = vpop.f32.mrf.mxu3 }
  0xea   : > { %v824_v3 = vmax.f32 %v808_v63, 0.0  ;;  %v632_v27 = vadd.f32 %v631_v1, %v582_v0 }
  0xec   : > { %v1157_v6 = vpack.c.bf16 %v824_v3, %v823_v2  ;;  %v796_v7 = vmul.f32 %v779_v4, %v632_v27 }
  0xee   : > { %1181 = vst [vmem:[%s1431_s19 + $0x18] sm:$0xff] %v1157_v6   ;;  %v816_v8 = vadd.f32 %v1421_v30, %v796_v7 }
  0xf0   : > { %v832_v45 = vmax.f32 %v816_v8, 0.0 }
  0xf2   : > { %v1177_v10 = vpack.c.bf16 %v832_v45, %v831_v9 }
  0xf4   : > { %1185 = vst [vmem:[%s1431_s19 + $0x38] sm:$0xff] %v1177_v10  }
  0xf5 PF: > { %s14_s17 = sadd.s32 1, %s1253_s17   ;;  %s1473_s15 = smov %s1249_s16 }
  0xf6   : > { %p11_p5 = scmp.ge.s32.totalorder %s14_s17, 4   ;;  %s1474_s16 = smov %s1476_s18 }
  0xf8   :  { %13 = sbr.rel (!%p11_p5) target bundleno = 2 (0x2), region = 80 }

</bundles_post_ra>
